<compile_context>
chip_gen: v7x
topology: tpu7x:2x2x1
jax: 0.10.0
libtpu: 0.0.40
codegen_flags: <defaults>
</compile_context>

<pallas_src>
import jax
import jax.numpy as jnp
from jax.experimental import pallas as pl
from jax.experimental.pallas import tpu as pltpu


# ----------------------------- Pallas kernel -----------------------------

def _bias_add_kernel(x_ref, b_ref, o_ref):
    # x_ref: (TM, TL) activation tile; b_ref: (TM, 1) per-row bias column.
    # The (TM, 1) column lane-broadcasts across the 128-lane axis on the VPU.
    o_ref[...] = x_ref[...] + b_ref[...]


# ----------------------------- wrapper -----------------------------

def _round_up(x, m):
    return ((x + m - 1) // m) * m


def learnable_bias_forward(x, bias):
    """LearnableBias.forward: out = x + bias.expand_as(x).

    x    : (N, C, H, W)  (PyTorch NCHW layout)
    bias : (1, C, 1, 1) or (C,)
    """
    N, C, H, W = x.shape
    dtype = x.dtype
    b = bias.reshape(C).astype(dtype)

    # Lane-dense 2-D view: rows = N*C (sublane axis), lanes = H*W (lane axis).
    # Pure reshape — NCHW row-major contiguity is preserved, no transpose.
    M, L = N * C, H * W
    x2 = x.reshape(M, L)
    # Per-row bias column: row (n, c) -> bias[c].  Size N*C floats (negligible).
    b_row = jnp.broadcast_to(b[None, :], (N, C)).reshape(M, 1)

    # Large (8, 128)-aligned tiles; mem-bound elementwise favors big blocks.
    TM = min(512, _round_up(M, 8))
    TL = min(2048, _round_up(L, 128))
    Mp = _round_up(M, TM)
    Lp = _round_up(L, TL)
    if (Mp, Lp) != (M, L):
        x2 = jnp.pad(x2, ((0, Mp - M), (0, Lp - L)))
        b_row = jnp.pad(b_row, ((0, Mp - M), (0, 0)))

    grid = (Mp // TM, Lp // TL)

    out = pl.pallas_call(
        _bias_add_kernel,
        out_shape=jax.ShapeDtypeStruct((Mp, Lp), dtype),
        grid_spec=pltpu.PrefetchScalarGridSpec(
            num_scalar_prefetch=0,
            grid=grid,
            in_specs=[
                pl.BlockSpec((TM, TL), lambda i, j: (i, j)),  # activation tile
                pl.BlockSpec((TM, 1), lambda i, j: (i, 0)),   # per-row bias col
            ],
            out_specs=pl.BlockSpec((TM, TL), lambda i, j: (i, j)),
        ),
        compiler_params=pltpu.CompilerParams(
            dimension_semantics=("parallel", "parallel")),  # megacore on v7x
    )(x2, b_row)

    if (Mp, Lp) != (M, L):
        out = out[:M, :L]
    return out.reshape(N, C, H, W)


# ----------------------------- main -----------------------------

if __name__ == "__main__":
    key = jax.random.PRNGKey(0)
    xkey, bkey = jax.random.split(key)

    N, C, H, W = 2, 4, 16, 16
    x = jax.random.normal(xkey, (N, C, H, W), jnp.float32)
    # torch initializes the LearnableBias parameter to zeros; use small non-zero
    # deterministic values so the broadcast-add path is actually exercised.
    bias = jax.random.normal(bkey, (1, C, 1, 1), jnp.float32) * 0.1

    fwd = jax.jit(learnable_bias_forward)
    out = fwd(x, bias)
    jax.block_until_ready(out)

    # Reference check against the pure-JAX definition of the module.
    ref = x + jnp.broadcast_to(bias, x.shape)
    assert out.shape == (N, C, H, W), out.shape
    assert jnp.all(jnp.isfinite(out))
    assert jnp.allclose(out, ref, atol=1e-6, rtol=1e-6), float(
        jnp.max(jnp.abs(out - ref)))
    print("KERNEL_OK")
</pallas_src>

<mosaic_0001>
module attributes {stable_mosaic.version = 11 : i64} {
  func.func @_bias_add_kernel(%arg0: i32, %arg1: i32, %arg2: memref<8x256xf32, #tpu.memory_space<vmem>>, %arg3: memref<8x1xf32, #tpu.memory_space<vmem>>, %arg4: memref<8x256xf32, #tpu.memory_space<vmem>>) attributes {dimension_semantics = [#tpu.dimension_semantics<parallel>, #tpu.dimension_semantics<parallel>], iteration_bounds = array<i64: 1, 1>, scalar_prefetch = 0 : i64, scratch_operands = 0 : i64, tpu.core_type = #tpu.core_type<tc>, window_params = [{transform_indices = @transform_0, window_bounds = array<i64: 8, 256>}, {transform_indices = @transform_1, window_bounds = array<i64: 8, 1>}, {transform_indices = @transform_2, window_bounds = array<i64: 8, 256>}]} {
    %c0 = arith.constant 0 : index
    %c0_0 = arith.constant 0 : index
    %0 = vector.load %arg2[%c0, %c0_0] : memref<8x256xf32, #tpu.memory_space<vmem>>, vector<8x256xf32>
    %c0_1 = arith.constant 0 : index
    %c0_2 = arith.constant 0 : index
    %1 = vector.load %arg3[%c0_1, %c0_2] : memref<8x1xf32, #tpu.memory_space<vmem>>, vector<8x1xf32>
    %2 = vector.broadcast %1 : vector<8x1xf32> to vector<8x256xf32>
    %3 = arith.addf %0, %2 : vector<8x256xf32>
    %c0_3 = arith.constant 0 : index
    %c0_4 = arith.constant 0 : index
    %4 = vector.load %arg4[%c0_3, %c0_4] : memref<8x256xf32, #tpu.memory_space<vmem>>, vector<8x256xf32>
    tpu.vector_store %arg4[%c0_3, %c0_4], %3 {strides = array<i32>} : memref<8x256xf32, #tpu.memory_space<vmem>>, vector<8x256xf32>,
    return
  }
  func.func @transform_0(%arg0: i32, %arg1: i32) -> (i32, i32) {
    %c0_i32 = arith.constant 0 : i32
    return %arg0, %arg1 : i32, i32
  }
  func.func @transform_1(%arg0: i32, %arg1: i32) -> (i32, i32) {
    %c0_i32 = arith.constant 0 : i32
    %c0_i32_0 = arith.constant 0 : i32
    return %arg0, %c0_i32 : i32, i32
  }
  func.func @transform_2(%arg0: i32, %arg1: i32) -> (i32, i32) {
    %c0_i32 = arith.constant 0 : i32
    return %arg0, %arg1 : i32, i32
  }
}

</mosaic_0001>

<bundles_post_ra>
// kernel: learnable_bias_forward.1
= control target key start
LH: loop header
LB: loop body
LE: loop exit
PB: predicated region body
PF: predicated region fallthrough
CT: control target
= control target key end

     0   :  { %v29_v0 = vmov 0   ;;  %s60_s1 = inlined_call_operand.vmem [shape: f32[8,1], index: 1, kind: input, shape index: {}]   ;;  %s61_s0 = inlined_call_operand.vmem [shape: f32[8,256], index: 0, kind: input, shape index: {}]   ;;  %s62_s2 = inlined_call_operand.vmem [shape: f32[8,256], index: 2, kind: output, shape index: {}]  }
   0x1   :  { %28 = vset.pattern.permute.xlu0 %v29_v0  ;;  %v13_v1 = vld [vmem:[%s60_s1] sm:$0xff]  ;;  %v12_v3 = vld [vmem:[%s61_s0 + $0x8] sm:$0xff] }
   0x2   :  { %16 = vperm.xlu0 %28, %v13_v1   ;;  %v11_v2 = vld [vmem:[%s61_s0] sm:$0xff] }
  0x81   :  { %v17_v4 = vpop.permute.xlu0 %16 }
  0x82   :  { %v19_v5 = vadd.f32 %v17_v4, %v11_v2  ;;  %v20_v6 = vadd.f32 %v17_v4, %v12_v3 }
  0x84   :  { %21 = vst [vmem:[%s62_s2] sm:$0xff] %v19_v5  ;;  %22 = vst [vmem:[%s62_s2 + $0x8] sm:$0xff] %v20_v6 }

</bundles_post_ra>
